<compile_context>
chip_gen: v7x
topology: tpu7x:2x2x1
jax: 0.10.0
libtpu: 0.0.40
codegen_flags: <defaults>
</compile_context>

<pallas_src>
import math
import functools

import jax
import jax.numpy as jnp
from jax.experimental import pallas as pl
from jax.experimental.pallas import tpu as pltpu


def _round_up(x, m):
    return (x + m - 1) // m * m


def _cdiv(a, b):
    return (a + b - 1) // b


def _vmem_capacity_bytes():
    """Per-TensorCore VMEM capacity for the current chip generation."""
    try:
        info = pltpu.get_tpu_info()
        cap = int(getattr(info, "vmem_capacity_bytes", 0) or 0)
        if cap > 0:
            return cap
    except Exception:
        pass
    return 64 << 20          # v7x per-core VMEM (smallest current generation): safe fallback


def _pick_time_tile(t, halo, c_in, c_out, budget_bytes, max_time_tile=None):
    """Largest 128-multiple time tile whose double-buffered in/out (+ carry or prev-tile
    halo source) working set fits the VMEM budget.

    The grid is a cdiv grid, so T does not have to divide the tile: the last block is
    partial, its out-of-range lanes are masked on store, and garbage read there never
    reaches a valid output lane (each output lane only depends on earlier lanes and the
    explicitly masked-in left context)."""
    lane_bytes = 4 * (5 * c_in + 3 * c_out)              # conservative worst-path + slack
    cap = max(128, budget_bytes // lane_bytes // 128 * 128)
    cap = min(cap, 128 * 1024)                           # diminishing returns past ~128K lanes
    if max_time_tile is not None:
        cap = min(cap, max(128, max_time_tile // 128 * 128))
    t_ceil = _round_up(t, 128)
    if t_ceil <= cap:
        return t_ceil                                    # whole sequence in one tile
    num_t = _cdiv(t_ceil, cap)
    t_tile = _round_up(_cdiv(t_ceil, num_t), 128)
    # The roll+mask halo scheme needs each tile to cover the full causal halo.
    return max(t_tile, _round_up(max(halo, 1), 128))


def _wavenet_conv1d_kernel(x_ref, *args, kernel_size, dilation, halo,
                           use_act, use_mxu, has_prev, has_carry):
    """One (batch n, time-tile j) grid step, time-in-lanes (NCW) layout.

    x_ref:      (C_in, T_TILE)          current input time tile
    xprev_ref:  (C_in, T_TILE)          previous input tile (only when has_prev)
    w_ref:      (K, C_in, C_out, 1)  [VPU path]   or   (C_out, K*C_in) bf16 [MXU path]
    b_ref:      (C_out, 1)
    o_ref:      (C_out, T_TILE)
    carry_ref:  (C_in, T_TILE)          previous tile's input (only when has_carry)
    """
    idx = 0
    xprev_ref = None
    if has_prev:
        xprev_ref = args[idx]
        idx += 1
    w_ref, b_ref, o_ref = args[idx], args[idx + 1], args[idx + 2]
    carry_ref = args[idx + 3] if has_carry else None

    j = pl.program_id(1)
    c_in, t_tile = x_ref.shape
    c_out = o_ref.shape[0]

    x = x_ref[...]                                        # (C_in, T_TILE)

    prev = None
    if halo > 0:
        if has_carry:
            # Sequential time axis: causal left context carried in VMEM scratch.
            @pl.when(j == 0)
            def _():
                carry_ref[...] = jnp.zeros_like(carry_ref)
            prev = carry_ref[...]
        elif has_prev:
            # Independent time tiles (both grid axes "parallel"): the left context is a
            # redundant read of the previous input tile; zeroed on the first tile.
            prev = xprev_ref[...] * (j > 0).astype(x.dtype)
        # else: single time tile -> left context is implicit zeros.

    lane = jax.lax.broadcasted_iota(jnp.int32, (1, t_tile), 1) if halo > 0 else None

    def tap(k):
        """Input shifted so lane t holds x_global[t - (halo - k*dilation)]."""
        shift = halo - k * dilation
        if shift == 0:
            return x                                      # aligned tap: free
        shift_eff = shift % t_tile
        x_s = pltpu.roll(x, shift=shift_eff, axis=1) if shift_eff else x
        mask = lane >= shift                              # lanes < shift need left context
        if prev is None:
            return jnp.where(mask, x_s, jnp.zeros_like(x_s))
        p_s = pltpu.roll(prev, shift=shift_eff, axis=1) if shift_eff else prev
        return jnp.where(mask, x_s, p_s)

    if use_mxu:
        # Large-channel path: im2col -> one (C_out, K*C_in) @ (K*C_in, T_TILE) bf16 MXU
        # matmul per tile with f32 accumulation.
        # TODO(synk): pad C_in/C_out to MXU-native multiples (256 on v6e/v7x) for peak use.
        if kernel_size > 1:
            xs = jnp.concatenate([tap(k) for k in range(kernel_size)], axis=0)
        else:
            xs = x
        acc = jnp.dot(w_ref[...], xs.astype(jnp.bfloat16),
                      preferred_element_type=jnp.float32)
    else:
        # Tiny contraction dim (WaveNet: C_in=4, K<=2): VPU broadcast-FMAs, all 128
        # lanes busy on time.
        w = w_ref[...]                                    # (K, C_in, C_out, 1), tiny
        acc = jnp.zeros((c_out, t_tile), dtype=jnp.float32)
        for k in range(kernel_size):
            xk = tap(k)
            for ci in range(c_in):
                acc = acc + w[k, ci] * xk[ci:ci + 1, :]   # (C_out,1)*(1,T_TILE)

    acc = acc + b_ref[...]                                # bias lane-broadcast

    if use_act:
        # Softsign x / (1 + |x|): EUP approximate reciprocal + two Newton-Raphson steps
        # (error ~ulp(f32)); keeps the divide off the VALU.
        d = 1.0 + jnp.abs(acc)
        r = pl.reciprocal(d, approx=True)
        r = r * (2.0 - d * r)
        r = r * (2.0 - d * r)
        acc = acc * r

    o_ref[...] = acc.astype(o_ref.dtype)                  # lane-dense store (T in lanes)

    if has_carry:
        # This tile's input becomes the next tile's causal left context.  A partial last
        # tile writes garbage in its tail, which is harmless: the carry is reset at j==0
        # before it is ever read again (time axis is innermost + "arbitrary").
        carry_ref[...] = x


def conv_forward(signal, weight, bias, *, kernel_size, dilation,
                 is_causal, use_act, max_time_tile=None):
    """Forward pass matching Conv.forward (stride=1, the only exercised case).

    signal : (N, C_in, T)      float32   (PyTorch NCW layout, consumed as-is, no pad/transpose)
    weight : (C_out, C_in, K)  float32   (PyTorch Conv1d weight layout)
    bias   : (C_out,)          float32
    returns: (N, C_out, T)     if causal or K==1, else (N, C_out, T - (K-1)*dilation)
    """
    n, c_in, t = signal.shape
    c_out = weight.shape[0]
    halo = (kernel_size - 1) * dilation

    capacity = _vmem_capacity_bytes()
    budget = max(8 << 20, int(capacity * 0.4))
    t_tile = _pick_time_tile(t, halo, c_in, c_out, budget, max_time_tile)
    num_t = _cdiv(t, t_tile)

    use_mxu = (c_in >= 128 and c_out >= 128)
    # Causal left-context plumbing across time tiles:
    #   prev-input path (N==1): both grid axes "parallel" so v7x megacore can split time,
    #     paid for with a redundant read of the previous input tile (tiny for WaveNet C_in).
    #   carry path: sequential ("arbitrary") time axis, VMEM scratch holds the prev tile.
    # TODO(synk): gate the prev-input path on an actual core-count query rather than N alone.
    use_prev = halo > 0 and num_t > 1 and n == 1
    use_carry = halo > 0 and num_t > 1 and not use_prev

    # Weight / bias reshapes are negligible (tiny tensors); the signal is consumed in its
    # native NCW layout with no pad and no transpose.
    if use_mxu:
        # (C_out, K*C_in) with tap-major columns, bf16 MXU feed.
        w = jnp.transpose(weight, (0, 2, 1)).reshape(c_out, kernel_size * c_in)
        w = w.astype(jnp.bfloat16)
        w_spec = pl.BlockSpec(w.shape, lambda nn, jj: (0, 0))
    else:
        w = jnp.transpose(weight, (2, 1, 0))[..., None]      # (K, C_in, C_out, 1)
        w_spec = pl.BlockSpec(w.shape, lambda nn, jj: (0, 0, 0, 0))
    b = bias.reshape(c_out, 1)

    kernel = functools.partial(
        _wavenet_conv1d_kernel,
        kernel_size=kernel_size, dilation=dilation, halo=halo,
        use_act=use_act, use_mxu=use_mxu,
        has_prev=use_prev, has_carry=use_carry)

    in_specs = [pl.BlockSpec((None, c_in, t_tile), lambda nn, jj: (nn, 0, jj))]
    operands = [signal]
    if use_prev:
        in_specs.append(pl.BlockSpec((None, c_in, t_tile),
                                     lambda nn, jj: (nn, 0, jnp.maximum(jj - 1, 0))))
        operands.append(signal)
    in_specs += [w_spec, pl.BlockSpec((c_out, 1), lambda nn, jj: (0, 0))]
    operands += [w, b]

    scratch_shapes = []
    if use_carry:
        scratch_shapes.append(pltpu.VMEM((c_in, t_tile), signal.dtype))

    # Generation-aware scoped-VMEM limit: enough for the chosen tiles, never above the
    # chip's physical per-core capacity (64 MiB on v7x vs 128 MiB on v5e/v6e).
    tile_bytes = 4 * t_tile * (
        (2 + (2 if use_prev else 0) + (1 if use_carry else 0)) * c_in + 2 * c_out)
    if use_mxu:
        tile_bytes += 4 * t_tile * kernel_size * c_in        # im2col staging
    vmem_limit = int(min(capacity - (4 << 20), max(32 << 20, 2 * tile_bytes)))
    vmem_limit = max(vmem_limit, 16 << 20)

    # NOTE: with the enlarged tiles each grid step is long enough to hide the input DMA,
    # so pipeline_mode=pl.Buffered(3) on the signal spec was evaluated and not needed.
    time_sem = "arbitrary" if use_carry else "parallel"

    out = pl.pallas_call(
        kernel,
        out_shape=jax.ShapeDtypeStruct((n, c_out, t), signal.dtype),
        grid_spec=pltpu.PrefetchScalarGridSpec(
            num_scalar_prefetch=0,
            grid=(n, num_t),
            in_specs=in_specs,
            out_specs=pl.BlockSpec((None, c_out, t_tile),
                                   lambda nn, jj: (nn, 0, jj)),
            scratch_shapes=scratch_shapes),
        compiler_params=pltpu.CompilerParams(
            dimension_semantics=("parallel", time_sem),
            vmem_limit_bytes=vmem_limit),
    )(*operands)

    if is_causal or halo == 0:
        return out
    # Non-causal 'valid' conv = causal conv minus the first `halo` warm-up samples.
    return out[:, :, halo:]


def _reference(signal, weight, bias, *, kernel_size, dilation, is_causal, use_act):
    """Pure-JAX reference (lax conv) for correctness checking."""
    x = signal
    if is_causal:
        pad = (kernel_size - 1) * dilation
        x = jnp.pad(x, ((0, 0), (0, 0), (pad, 0)))
    out = jax.lax.conv_general_dilated(
        x, weight, window_strides=(1,), padding='VALID',
        rhs_dilation=(dilation,),
        dimension_numbers=('NCH', 'OIH', 'NCH'))
    out = out + bias[None, :, None]
    if use_act:
        out = out / (1.0 + jnp.abs(out))
    return out


def _init_params(key, in_channels, out_channels, kernel_size):
    """Mimics the module __init__: xavier_uniform weight (gain=1), default Conv1d bias."""
    k_w, k_b = jax.random.split(key)
    fan_in = in_channels * kernel_size
    fan_out = out_channels * kernel_size
    w_bound = math.sqrt(6.0 / (fan_in + fan_out))
    weight = jax.random.uniform(k_w, (out_channels, in_channels, kernel_size),
                                jnp.float32, -w_bound, w_bound)
    b_bound = 1.0 / math.sqrt(fan_in)
    bias = jax.random.uniform(k_b, (out_channels,), jnp.float32, -b_bound, b_bound)
    return weight, bias


if __name__ == "__main__":
    key = jax.random.PRNGKey(0)

    # (name, N, C_in, C_out, K, dilation, is_causal, use_act, T, max_time_tile, tol)
    # max_time_tile is only used here to force the multi-tile (carry / parallel) paths
    # at small T; production calls leave it None and get VMEM-budget-sized tiles.
    cases = [
        ("causal_k2_softsign", 2, 4, 8, 2, 2, True,  True,    16, None, 1e-4),
        ("noncausal_k2",       2, 4, 8, 2, 1, False, False,   16, None, 1e-5),
        ("pointwise_k1",       2, 4, 8, 1, 1, False, False,   16, None, 1e-5),
        ("tiled_carry",        2, 4, 8, 2, 4, True,  False, 2048,  512, 1e-5),
        ("tiled_carry_ragged", 2, 4, 8, 2, 4, True,  False, 1900,  512, 1e-5),
        ("tiled_parallel_n1",  1, 4, 8, 2, 4, True,  False, 2048,  512, 1e-5),
    ]

    for (name, batch, c_in, c_out, ksz, dil, causal, act, seq, mtt, tol) in cases:
        key, k_sig, k_par = jax.random.split(key, 3)
        weight, bias = _init_params(k_par, c_in, c_out, ksz)
        signal = jax.random.normal(k_sig, (batch, c_in, seq), jnp.float32)

        out = conv_forward(signal, weight, bias,
                           kernel_size=ksz, dilation=dil,
                           is_causal=causal, use_act=act,
                           max_time_tile=mtt)
        out = jax.block_until_ready(out)

        ref = _reference(signal, weight, bias,
                         kernel_size=ksz, dilation=dil,
                         is_causal=causal, use_act=act)
        assert out.shape == ref.shape, (name, out.shape, ref.shape)
        err = float(jnp.max(jnp.abs(out - ref)))
        assert jnp.allclose(out, ref, atol=tol, rtol=tol), f"{name}: max err {err}"

    print("KERNEL_OK")
</pallas_src>

<mosaic_0001>
module attributes {stable_mosaic.version = 11 : i64} {
  func.func @_wavenet_conv1d_kernel(%arg0: i32, %arg1: i32, %arg2: memref<1x4x128xf32, #tpu.memory_space<vmem>>, %arg3: memref<2x4x8x1xf32, #tpu.memory_space<vmem>>, %arg4: memref<8x1xf32, #tpu.memory_space<vmem>>, %arg5: memref<1x8x128xf32, #tpu.memory_space<vmem>>) attributes {dimension_semantics = [#tpu.dimension_semantics<parallel>, #tpu.dimension_semantics<parallel>], iteration_bounds = array<i64: 2, 1>, scalar_prefetch = 0 : i64, scratch_operands = 0 : i64, tpu.core_type = #tpu.core_type<tc>, window_params = [{transform_indices = @transform_0, window_bounds = array<i64: 1, 4, 128>}, {pipeline_mode = #tpu.pipeline_mode<synchronous>, transform_indices = @transform_1, window_bounds = array<i64: 2, 4, 8, 1>}, {pipeline_mode = #tpu.pipeline_mode<synchronous>, transform_indices = @transform_2, window_bounds = array<i64: 8, 1>}, {transform_indices = @transform_3, window_bounds = array<i64: 1, 8, 128>}]} {
    %c0 = arith.constant 0 : index
    %c0_0 = arith.constant 0 : index
    %c0_1 = arith.constant 0 : index
    %0 = vector.load %arg2[%c0, %c0_0, %c0_1] : memref<1x4x128xf32, #tpu.memory_space<vmem>>, vector<1x4x128xf32>
    %1 = vector.shape_cast %0 : vector<1x4x128xf32> to vector<4x128xf32>
    %2 = tpu.iota {dimensions = array<i32: 1>} : vector<1x128xi32>
    %c0_2 = arith.constant 0 : index
    %c0_3 = arith.constant 0 : index
    %c0_4 = arith.constant 0 : index
    %c0_5 = arith.constant 0 : index
    %3 = vector.load %arg3[%c0_2, %c0_3, %c0_4, %c0_5] : memref<2x4x8x1xf32, #tpu.memory_space<vmem>>, vector<2x4x8x1xf32>
    %cst = arith.constant 0.000000e+00 : f32
    %4 = vector.broadcast %cst : f32 to vector<8x128xf32>
    %c2_i32 = arith.constant 2 : i32
    %5 = tpu.dynamic_rotate %1 by %c2_i32 dim 1 : vector<4x128xf32>, i32 -> vector<4x128xf32>
    %c2_i32_6 = arith.constant 2 : i32
    %6 = vector.broadcast %c2_i32_6 : i32 to vector<1x128xi32>
    %7 = arith.cmpi sge, %2, %6 : vector<1x128xi32>
    %cst_7 = arith.constant 0.000000e+00 : f32
    %8 = vector.broadcast %cst_7 : f32 to vector<4x128xf32>
    %9 = vector.shape_cast %7 : vector<1x128xi1> to vector<1x128xi1>
    %10 = vector.broadcast %9 : vector<1x128xi1> to vector<4x128xi1>
    %11 = arith.select %10, %5, %8 : vector<4x128xi1>, vector<4x128xf32>
    %12 = vector.extract_strided_slice %3 {offsets = [0, 0, 0, 0], sizes = [1, 1, 8, 1], strides = [1, 1, 1, 1]} : vector<2x4x8x1xf32> to vector<1x1x8x1xf32>
    %13 = vector.shape_cast %12 : vector<1x1x8x1xf32> to vector<8x1xf32>
    %14 = vector.extract_strided_slice %11 {offsets = [0, 0], sizes = [1, 128], strides = [1, 1]} : vector<4x128xf32> to vector<1x128xf32>
    %15 = vector.broadcast %13 : vector<8x1xf32> to vector<8x128xf32>
    %16 = vector.broadcast %14 : vector<1x128xf32> to vector<8x128xf32>
    %17 = arith.mulf %15, %16 : vector<8x128xf32>
    %18 = arith.addf %4, %17 : vector<8x128xf32>
    %19 = vector.extract_strided_slice %3 {offsets = [0, 1, 0, 0], sizes = [1, 1, 8, 1], strides = [1, 1, 1, 1]} : vector<2x4x8x1xf32> to vector<1x1x8x1xf32>
    %20 = vector.shape_cast %19 : vector<1x1x8x1xf32> to vector<8x1xf32>
    %21 = vector.extract_strided_slice %11 {offsets = [1, 0], sizes = [1, 128], strides = [1, 1]} : vector<4x128xf32> to vector<1x128xf32>
    %22 = vector.broadcast %20 : vector<8x1xf32> to vector<8x128xf32>
    %23 = vector.broadcast %21 : vector<1x128xf32> to vector<8x128xf32>
    %24 = arith.mulf %22, %23 : vector<8x128xf32>
    %25 = arith.addf %18, %24 : vector<8x128xf32>
    %26 = vector.extract_strided_slice %3 {offsets = [0, 2, 0, 0], sizes = [1, 1, 8, 1], strides = [1, 1, 1, 1]} : vector<2x4x8x1xf32> to vector<1x1x8x1xf32>
    %27 = vector.shape_cast %26 : vector<1x1x8x1xf32> to vector<8x1xf32>
    %28 = vector.extract_strided_slice %11 {offsets = [2, 0], sizes = [1, 128], strides = [1, 1]} : vector<4x128xf32> to vector<1x128xf32>
    %29 = vector.broadcast %27 : vector<8x1xf32> to vector<8x128xf32>
    %30 = vector.broadcast %28 : vector<1x128xf32> to vector<8x128xf32>
    %31 = arith.mulf %29, %30 : vector<8x128xf32>
    %32 = arith.addf %25, %31 : vector<8x128xf32>
    %33 = vector.extract_strided_slice %3 {offsets = [0, 3, 0, 0], sizes = [1, 1, 8, 1], strides = [1, 1, 1, 1]} : vector<2x4x8x1xf32> to vector<1x1x8x1xf32>
    %34 = vector.shape_cast %33 : vector<1x1x8x1xf32> to vector<8x1xf32>
    %35 = vector.extract_strided_slice %11 {offsets = [3, 0], sizes = [1, 128], strides = [1, 1]} : vector<4x128xf32> to vector<1x128xf32>
    %36 = vector.broadcast %34 : vector<8x1xf32> to vector<8x128xf32>
    %37 = vector.broadcast %35 : vector<1x128xf32> to vector<8x128xf32>
    %38 = arith.mulf %36, %37 : vector<8x128xf32>
    %39 = arith.addf %32, %38 : vector<8x128xf32>
    %40 = vector.extract_strided_slice %3 {offsets = [1, 0, 0, 0], sizes = [1, 1, 8, 1], strides = [1, 1, 1, 1]} : vector<2x4x8x1xf32> to vector<1x1x8x1xf32>
    %41 = vector.shape_cast %40 : vector<1x1x8x1xf32> to vector<8x1xf32>
    %42 = vector.extract_strided_slice %1 {offsets = [0, 0], sizes = [1, 128], strides = [1, 1]} : vector<4x128xf32> to vector<1x128xf32>
    %43 = vector.broadcast %41 : vector<8x1xf32> to vector<8x128xf32>
    %44 = vector.broadcast %42 : vector<1x128xf32> to vector<8x128xf32>
    %45 = arith.mulf %43, %44 : vector<8x128xf32>
    %46 = arith.addf %39, %45 : vector<8x128xf32>
    %47 = vector.extract_strided_slice %3 {offsets = [1, 1, 0, 0], sizes = [1, 1, 8, 1], strides = [1, 1, 1, 1]} : vector<2x4x8x1xf32> to vector<1x1x8x1xf32>
    %48 = vector.shape_cast %47 : vector<1x1x8x1xf32> to vector<8x1xf32>
    %49 = vector.extract_strided_slice %1 {offsets = [1, 0], sizes = [1, 128], strides = [1, 1]} : vector<4x128xf32> to vector<1x128xf32>
    %50 = vector.broadcast %48 : vector<8x1xf32> to vector<8x128xf32>
    %51 = vector.broadcast %49 : vector<1x128xf32> to vector<8x128xf32>
    %52 = arith.mulf %50, %51 : vector<8x128xf32>
    %53 = arith.addf %46, %52 : vector<8x128xf32>
    %54 = vector.extract_strided_slice %3 {offsets = [1, 2, 0, 0], sizes = [1, 1, 8, 1], strides = [1, 1, 1, 1]} : vector<2x4x8x1xf32> to vector<1x1x8x1xf32>
    %55 = vector.shape_cast %54 : vector<1x1x8x1xf32> to vector<8x1xf32>
    %56 = vector.extract_strided_slice %1 {offsets = [2, 0], sizes = [1, 128], strides = [1, 1]} : vector<4x128xf32> to vector<1x128xf32>
    %57 = vector.broadcast %55 : vector<8x1xf32> to vector<8x128xf32>
    %58 = vector.broadcast %56 : vector<1x128xf32> to vector<8x128xf32>
    %59 = arith.mulf %57, %58 : vector<8x128xf32>
    %60 = arith.addf %53, %59 : vector<8x128xf32>
    %61 = vector.extract_strided_slice %3 {offsets = [1, 3, 0, 0], sizes = [1, 1, 8, 1], strides = [1, 1, 1, 1]} : vector<2x4x8x1xf32> to vector<1x1x8x1xf32>
    %62 = vector.shape_cast %61 : vector<1x1x8x1xf32> to vector<8x1xf32>
    %63 = vector.extract_strided_slice %1 {offsets = [3, 0], sizes = [1, 128], strides = [1, 1]} : vector<4x128xf32> to vector<1x128xf32>
    %64 = vector.broadcast %62 : vector<8x1xf32> to vector<8x128xf32>
    %65 = vector.broadcast %63 : vector<1x128xf32> to vector<8x128xf32>
    %66 = arith.mulf %64, %65 : vector<8x128xf32>
    %67 = arith.addf %60, %66 : vector<8x128xf32>
    %c0_8 = arith.constant 0 : index
    %c0_9 = arith.constant 0 : index
    %68 = vector.load %arg4[%c0_8, %c0_9] : memref<8x1xf32, #tpu.memory_space<vmem>>, vector<8x1xf32>
    %69 = vector.broadcast %68 : vector<8x1xf32> to vector<8x128xf32>
    %70 = arith.addf %67, %69 : vector<8x128xf32>
    %71 = math.absf %70 : vector<8x128xf32>
    %cst_10 = arith.constant 1.000000e+00 : f32
    %72 = vector.broadcast %cst_10 : f32 to vector<8x128xf32>
    %73 = arith.addf %72, %71 : vector<8x128xf32>
    %74 = tpu.reciprocal %73 {approx = true} : vector<8x128xf32> -> vector<8x128xf32>
    %75 = arith.mulf %73, %74 : vector<8x128xf32>
    %cst_11 = arith.constant 2.000000e+00 : f32
    %76 = vector.broadcast %cst_11 : f32 to vector<8x128xf32>
    %77 = arith.subf %76, %75 : vector<8x128xf32>
    %78 = arith.mulf %74, %77 : vector<8x128xf32>
    %79 = arith.mulf %73, %78 : vector<8x128xf32>
    %cst_12 = arith.constant 2.000000e+00 : f32
    %80 = vector.broadcast %cst_12 : f32 to vector<8x128xf32>
    %81 = arith.subf %80, %79 : vector<8x128xf32>
    %82 = arith.mulf %78, %81 : vector<8x128xf32>
    %83 = arith.mulf %70, %82 : vector<8x128xf32>
    %c0_13 = arith.constant 0 : index
    %c0_14 = arith.constant 0 : index
    %c0_15 = arith.constant 0 : index
    %84 = vector.load %arg5[%c0_13, %c0_14, %c0_15] : memref<1x8x128xf32, #tpu.memory_space<vmem>>, vector<1x8x128xf32>
    %85 = vector.shape_cast %84 : vector<1x8x128xf32> to vector<8x128xf32>
    %86 = vector.shape_cast %83 : vector<8x128xf32> to vector<1x8x128xf32>
    tpu.vector_store %arg5[%c0_13, %c0_14, %c0_15], %86 {strides = array<i32>} : memref<1x8x128xf32, #tpu.memory_space<vmem>>, vector<1x8x128xf32>,
    return
  }
  func.func @transform_0(%arg0: i32, %arg1: i32) -> (i32, i32, i32) {
    %c0_i32 = arith.constant 0 : i32
    %c0_i32_0 = arith.constant 0 : i32
    return %arg0, %c0_i32, %arg1 : i32, i32, i32
  }
  func.func @transform_1(%arg0: i32, %arg1: i32) -> (i32, i32, i32, i32) {
    %c0_i32 = arith.constant 0 : i32
    %c0_i32_0 = arith.constant 0 : i32
    %c0_i32_1 = arith.constant 0 : i32
    %c0_i32_2 = arith.constant 0 : i32
    %c0_i32_3 = arith.constant 0 : i32
    return %c0_i32, %c0_i32_0, %c0_i32_1, %c0_i32_2 : i32, i32, i32, i32
  }
  func.func @transform_2(%arg0: i32, %arg1: i32) -> (i32, i32) {
    %c0_i32 = arith.constant 0 : i32
    %c0_i32_0 = arith.constant 0 : i32
    %c0_i32_1 = arith.constant 0 : i32
    return %c0_i32, %c0_i32_0 : i32, i32
  }
  func.func @transform_3(%arg0: i32, %arg1: i32) -> (i32, i32, i32) {
    %c0_i32 = arith.constant 0 : i32
    %c0_i32_0 = arith.constant 0 : i32
    return %arg0, %c0_i32, %arg1 : i32, i32, i32
  }
}

</mosaic_0001>

<bundles_post_ra>
// kernel: tpu_custom_call.1
= control target key start
LH: loop header
LB: loop body
LE: loop exit
PB: predicated region body
PF: predicated region fallthrough
CT: control target
= control target key end

     0   :  { %8 = vsyncpa [#allocation3], 0  ;;  %s714_s0 = inlined_call_operand.vmem [shape: f32[2,4,16], index: 0, kind: input, shape index: {}]   ;;  %s715_s1 = inlined_call_operand.vmem [shape: f32[2,4,8,1], index: 1, kind: input, shape index: {}]   ;;  %s716_s2 = inlined_call_operand.vmem [shape: f32[8,1], index: 2, kind: input, shape index: {}]   ;;  %s717_s3 = inlined_call_operand.hbm [shape: f32[2,8,16], index: 3, kind: output, shape index: {}]  }
   0x1   :  { %10 = vsyncpa [#allocation3 + $0x1], 0  ;;  %s575_s12 = smov 0   ;;  %s577_s13 = smov 0  }
   0x2   :  { %s579_s14 = smov 0   ;;  %s581_s15 = smov 0  }
   0x3   :  { %s583_s16 = smov 0   ;;  %s585_s17 = smov 0  }
   0x4 LB: > { %s400_s18 = sadd.s32 4294967295, %s550_s17   ;;  %s401_s19 = sadd.s32 4294967294, %s550_s17   ;;  %s550_s17 = sphi %s585_s17, %s16_s17   ;;  %s546_s16 = sphi %s583_s16, %s724_s16   ;;  %s542_s15 = sphi %s581_s15, %s723_s15   ;;  %s538_s14 = sphi %s579_s14, %s722_s14   ;;  %s534_s13 = sphi %s577_s13, %s721_s13   ;;  %s530_s12 = sphi %s575_s12, %s720_s12  }
   0x5   : > { %s28_s20 = sadd.s32 1, %s546_s16  ;;  %s107_s21 = sadd.s32 1, %s538_s14 }
   0x6   : > { %p30_p0 = scmp.ge.s32.totalorder %s28_s20, 2  ;;  %p117_p1 = scmp.ne.s32.totalorder %s538_s14, %s534_s13 }
   0x7   : > { %p118_p2 = scmp.eq.s32.totalorder %s400_s18, 1  ;;  %p123_p3 = scmp.ne.s32.totalorder %s534_s13, %s530_s12 }
   0x8   : > { %s726_s20 = smov (%p30_p0, %s28_s20), 0  ;;  %p124_p5 = scmp.eq.s32.totalorder %s401_s19, 1 }
   0x9   : > { %p615_p4 = por %p118_p2, %p117_p1  ;;  %s102_s23 = ssub.s32 %s546_s16, %s726_s20 }
   0xa   : > { %p404_p6 = scmp.ge.s32.totalorder %s550_s17, 1  ;;  %p105_p7 = scmp.eq.s32.totalorder %s102_s23, 0 }
   0xb   : > { %p622_p8 = por %p124_p5, %p123_p3  ;;  %p158_p9 = scmp.lt.s32.totalorder %s550_s17, 3 }
   0xc   : > { %s628_s25 = scalar_select %p105_p7, %s538_s14, %s107_s21  }
   0xd   : > { %p159_p10 = pnand %p404_p6, %p158_p9 }
   0xe   : > { %v196_v0 = vld [vmem:[%s715_s1 + $0x10] sm:$0xff] (!%p159_p10)  ;;  %v194_v1 = vld [vmem:[%s715_s1] sm:$0xff] (!%p159_p10)  ;;  %p184_p11 = scmp.lt.s32.totalorder (!%p159_p10), %s542_s15, 1  ;;  %v552_v2 = vmov (!%p159_p10), 0   ;;  %v195_v3 = vld [vmem:[%s715_s1 + $0x8] sm:$0xff] (!%p159_p10)  ;;  %s553_s10 = smov (!%p159_p10), 2   ;;  %v192_v11 = vlaneseq (!%p159_p10) }
   0xf   : > { %162 = sbr.rel (%p159_p10) target bundleno = 214 (0xd6), region = 32  ;;  %469 = vset.pattern.permute.xlu1 (!%p159_p10), %v552_v2  ;;  %468 = vset.pattern.permute.xlu0 (!%p159_p10), %v552_v2  ;;  %v197_v5 = vld [vmem:[%s715_s1 + $0x18] sm:$0xff] (!%p159_p10)  ;;  %v198_v6 = vld [vmem:[%s715_s1 + $0x20] sm:$0xff] (!%p159_p10)  ;;  %v199_v7 = vld [vmem:[%s715_s1 + $0x28] sm:$0xff] (!%p159_p10)  ;;  %s408_s8 = sshll.u32 (!%p159_p10), %s542_s15, 7 }
  0x10   : > { %232 = vperm.xlu1 (!%p159_p10), %469, %v196_v0   ;;  %210 = vperm.xlu0 (!%p159_p10), %468, %v194_v1   ;;  %v200_v8 = vld [vmem:[%s715_s1 + $0x30] sm:$0xff] (!%p159_p10)  ;;  %v201_v9 = vld [vmem:[%s715_s1 + $0x38] sm:$0xff] (!%p159_p10)  ;;  %v296_v10 = vld [vmem:[%s716_s2] sm:$0xff] (!%p159_p10)  ;;  %v193_v12 = vand.u32 (!%p159_p10), 127, %v192_v11  ;;  %v214_v13 = vshrl.u32 (!%p159_p10), %v192_v11, 7  ;;  %s667_s19 = scalar_lea.hbm (!%p159_p10), %s717_s3, %s408_s8 }
  0x12   : > { %vm204_vm0 = vcmp.ge.s32.totalorder (!%p159_p10), %v193_v12, 2  ;;  %v215_v16 = vsub.s32 (!%p159_p10), 0, %v214_v13  ;;  %v226_v17 = vsub.s32 (!%p159_p10), 1, %v214_v13  ;;  %v237_v18 = vsub.s32 (!%p159_p10), 2, %v214_v13 }
  0x13   : > { %v248_v21 = vsub.s32 (!%p159_p10), 3, %v214_v13 }
  0x14   : > { %221 = vperm.xlu0 (!%p159_p10), %468, %v195_v3  }
  0x16   : > { %s185_s30 = scalar_select %p184_p11, %s542_s15, 1 }
  0x17   : > { %s554_s15 = smov [#allocation2]  }
  0x18   : > { %s406_s6 = sshll.u32 %s185_s30, 2  ;;  %243 = vperm.xlu0 %468, %v197_v5   ;;  %s476_s26 = sshll.u32 %s554_s15, 4  ;;  %s477_s26 = int_to_ptr.vmem [resolvable:$false] %s476_s26 }
  0x19   : > { %s190_s9 = scalar_lea.vmem %s714_s0, %s406_s6  ;;  %s181_s6 = sand.u32 1, %s534_s13  }
  0x1a   : > { %v191_v4 = vld [vmem:[%s190_s9] sm:$0xf]  ;;  %s405_s7 = sshll.u32 %s181_s6, 3  ;;  %s315_s21 = scalar_lea.sflag [#allocation3], %s181_s6 }
  0x1b   : > { %202 = vrot.lane.b32.xlu1 %v191_v4, %s553_s10  ;;  %v260_v33 = vrot.slane %v191_v4, %v215_v16  ;;  %v271_v37 = vrot.slane %v191_v4, %v226_v17  ;;  %v282_v40 = vrot.slane %v191_v4, %v237_v18  ;;  %v293_v44 = vrot.slane %v191_v4, %v248_v21  ;;  %s183_s9 = scalar_lea.vmem [#allocation2], %s405_s7  ;;  %s478_s27 = scalar_lea.vmem %s477_s26, 256 }
  0x1c   : > { %265 = vperm.xlu0 %468, %v199_v7   ;;  %s329_s10 = sshll.u32 %s183_s9, 4  ;;  %s669_s10 = int_to_ptr.vmem [resolvable:$true] %s329_s10 }
  0x1d   : > { %s472_s23 = scalar_lea.vmem %s669_s10, 128  ;;  %p479_p1 = scmp.lt.s32.totalorder %s669_s10, %s477_s26 }
  0x1e   : > { %p473_p12 = scmp.ne.s32.totalorder %s669_s10, %s472_s23  ;;  %p480_p2 = scmp.lt.s32.totalorder %s478_s27, %s472_s23 }
  0x1f   : > { %254 = vperm.xlu1 %469, %v198_v6  }
  0x20   : > { %287 = vperm.xlu0 %468, %v201_v9   ;;  %p474_p13 = pnand %p473_p12, %p615_p4  ;;  %p481_p3 = por %p480_p2, %p479_p1 }
  0x22   : > { %p475_p0 = pneg %p474_p13 }
  0x23   : > { %276 = vperm.xlu1 %469, %v200_v8  }
  0x24   : > { %p482_p5 = pnand %p481_p3, %p475_p0 }
  0x27   : > { %299 = vperm.xlu1 %469, %v296_v10  }
  0x8f   : > { %v233_v14 = vpop.permute.xlu1 %232  ;;  %v211_v15 = vpop.permute.xlu0 %210 }
  0x93   : > { %v222_v19 = vpop.permute.xlu0 %221  ;;  %v203_v20 = vpop.permute.xlu1 %202 }
  0x94   : > { %v207_v22 = vsel %vm204_vm0, %v203_v20, 0.0 }
  0x95   : > { %v216_v23 = vrot.slane %v207_v22, %v215_v16  ;;  %v227_v24 = vrot.slane %v207_v22, %v226_v17  ;;  %v238_v25 = vrot.slane %v207_v22, %v237_v18  ;;  %v249_v29 = vrot.slane %v207_v22, %v248_v21 }
  0x97   : > { %v217_v26 = vmul.f32 %v216_v23, %v211_v15  ;;  %v228_v27 = vmul.f32 %v227_v24, %v222_v19  ;;  %v244_v28 = vpop.permute.xlu0 %243  ;;  %v239_v32 = vmul.f32 %v238_v25, %v233_v14 }
  0x98   : > { %v250_v35 = vmul.f32 %v249_v29, %v244_v28 }
  0x99   : > { %v229_v31 = vadd.f32 %v228_v27, %v217_v26 }
  0x9b   : > { %v240_v34 = vadd.f32 %v239_v32, %v229_v31  ;;  %v266_v36 = vpop.permute.xlu0 %265 }
  0x9c   : > { %v272_v43 = vmul.f32 %v271_v37, %v266_v36 }
  0x9d   : > { %v251_v38 = vadd.f32 %v250_v35, %v240_v34 }
  0x9e   : > { %v255_v30 = vpop.permute.xlu1 %254 }
  0x9f   : > { %v261_v39 = vmul.f32 %v260_v33, %v255_v30  ;;  %v288_v45 = vpop.permute.xlu0 %287 }
  0xa0   : > { %v294_v49 = vmul.f32 %v293_v44, %v288_v45 }
  0xa1   : > { %v262_v42 = vadd.f32 %v261_v39, %v251_v38 }
  0xa2   : > { %v277_v41 = vpop.permute.xlu1 %276 }
  0xa3   : > { %v273_v46 = vadd.f32 %v272_v43, %v262_v42  ;;  %v283_v47 = vmul.f32 %v282_v40, %v277_v41 }
  0xa5   : > { %v284_v48 = vadd.f32 %v283_v47, %v273_v46 }
  0xa6   : > { %v300_v51 = vpop.permute.xlu1 %299 }
  0xa7   : > { %v295_v50 = vadd.f32 %v294_v49, %v284_v48 }
  0xa9   : > { %v302_v52 = vadd.f32 %v300_v51, %v295_v50 }
  0xab   : > { %v303_v53 = vand.u32 2147483647, %v302_v52 }
  0xad   : > { %v304_v54 = vadd.f32 1.0, %v303_v53 }
  0xaf   : > { %470 = vrcp.f32 %v304_v54 }
  0xb9   : > { %v471_v55 = vpop.eup %470 }
  0xba   : > { %v306_v56 = vmul.f32 %v471_v55, %v304_v54 }
  0xbc   : > { %v307_v57 = vsub.f32 2.0, %v306_v56 }
  0xbe   : > { %v308_v58 = vmul.f32 %v471_v55, %v307_v57 }
  0xc0   : > { %v309_v59 = vmul.f32 %v308_v58, %v304_v54 }
  0xc2   : > { %v310_v60 = vsub.f32 2.0, %v309_v59 }
  0xc4   : > { %v311_v61 = vmul.f32 %v310_v60, %v308_v58 }
  0xc6   : > { %v312_v62 = vmul.f32 %v311_v61, %v302_v52 }
  0xc8   : > { %313 = vst [vmem:[%s183_s9] sm:$0xff] %v312_v62 }
  0xc9   : > { %485 = shalt.err (!%p482_p5)
}
  0xca   : > { %s486_s28 = scalar_lea.hbm %s667_s19, 128  ;;  %s490_s4 = scalar_lea.hbm %s717_s3, 256 }
  0xcb   : > { %p487_p6 = scmp.ne.s32.totalorder %s667_s19, %s486_s28  ;;  %p491_p10 = scmp.lt.u32.totalorder %s667_s19, %s717_s3 }
  0xcc   : > { %p492_p11 = scmp.lt.u32.totalorder %s490_s4, %s486_s28  ;;  %p494_p13 = scmp.lt.u32.totalorder %s486_s28, %s667_s19 }
  0xcd   : > { %p488_p7 = pnand %p487_p6, %p615_p4 }
  0xce   : > { %p493_p12 = por %p492_p11, %p491_p10 }
  0xcf   : > { %p489_p9 = pneg %p488_p7 }
  0xd0   : > { %p495_p0 = por %p494_p13, %p493_p12 }
  0xd2   : > { %p496_p1 = pnand %p495_p0, %p489_p9 }
  0xd4   : > { %499 = shalt.err (!%p496_p1)
}
  0xd5   : > { %411 = dma.vmem_to_hbm [thread:$0]  (%p615_p4), %s669_s10, 128, %s667_s19, %s315_s21  }
  0xd6 PF: > { %p417_p2 = scmp.ge.s32.totalorder %s550_s17, 2  ;;  %s341_s7 = sand.u32 1, %s530_s12  }
  0xd7   : > { %s342_s8 = scalar_lea.sflag [#allocation3], %s341_s7 }
  0xd8   : > { %p414_p3 = pnand %p417_p2, %p622_p8 }
  0xda   : > { %525 = dma.done.wait (!%p414_p3), %s342_s8, 128  }
  0xdb   : > { %527 = vsyncadd (!%p414_p3), %s342_s8, 4294967168  ;;  %s16_s17 = sadd.s32 1, %s550_s17   ;;  %s720_s12 = smov %s534_s13 }
  0xdc   : > { %p13_p5 = scmp.ge.s32.totalorder %s16_s17, 4   ;;  %s721_s13 = smov %s538_s14 }
  0xdd   : > { %s722_s14 = smov %s628_s25  ;;  %s723_s15 = smov %s546_s16 }
  0xde   : > { %s724_s16 = smov %s726_s20  ;;  %15 = sbr.rel (!%p13_p5) target bundleno = 4 (0x4), region = 67 }
  0xe5   :  { %347 = vsyncpa [#allocation3], 1 }
  0xe6   :  { %349 = vsyncpa [#allocation3 + $0x1], 1 }

</bundles_post_ra>
